<compile_context>
chip_gen: v7x
topology: tpu7x:2x2x1
jax: 0.10.0
libtpu: 0.0.40
codegen_flags: <defaults>
</compile_context>

<pallas_src>
import functools

import jax
import jax.numpy as jnp
from jax.experimental import pallas as pl
from jax.experimental.pallas import tpu as pltpu

_LANE = 128


def _round_up(x: int, m: int) -> int:
    return ((x + m - 1) // m) * m


def _round_down(x: int, m: int) -> int:
    return (x // m) * m


def _cdiv(a: int, b: int) -> int:
    return -(-a // b)


def _vmem_capacity_bytes() -> int:
    """Physical VMEM per TensorCore; conservative fallback = v7x (64 MiB)."""
    try:
        cap = int(pltpu.get_tpu_info().vmem_capacity_bytes)
        if cap > 0:
            return cap
    except Exception:
        pass
    return 64 << 20


def _plan_tiling(n: int, c: int, t: int, itemsize: int, tile_budget: int):
    """Choose (b_blk, num_n_blocks, tile_t, tiles_per_split, splits)."""
    t128 = _round_up(t, _LANE)
    # sublane-padded class count (f32 -> 8, bf16 -> 16, int8 -> 32)
    sub = 8 * max(1, 4 // itemsize)
    c_pad = _round_up(c, sub)
    # bytes per time-bin per sample in VMEM: logits plane + sublane-padded int32 target
    row_bytes = c_pad * itemsize + 8 * 4

    max_lanes = _round_down(tile_budget // (2 * row_bytes), _LANE)

    if max_lanes >= t128:
        # Whole T per step; fold as many samples per block as the budget allows.
        per_sample = t128 * row_bytes
        b_blk = max(1, min(n, tile_budget // (2 * per_sample)))
        num_n_blocks = _cdiv(n, b_blk)
        if num_n_blocks == 1 and n >= 2:
            # Keep >= 2 parallel batch blocks so megacore (v7x) has work on both cores.
            b_blk = _cdiv(n, 2)
            num_n_blocks = _cdiv(n, b_blk)
        tile_t, tiles_per_split, splits = t128, 1, 1
        if n == 1 and num_n_blocks == 1 and t128 >= 2 * _LANE:
            # Single sample: split T across a size-2 parallel axis (no cost on 1-TC chips).
            splits = 2
            tile_t = _round_up(_cdiv(t128, 2), _LANE)
            tiles_per_split = 1
    else:
        # T does not fit in one tile even for a single sample: tile T, accumulate.
        b_blk = 1
        num_n_blocks = n
        tile_t = max(max_lanes, _LANE)
        num_t_tiles = _cdiv(t128, tile_t)
        splits = 2 if (n == 1 and num_t_tiles >= 2) else 1
        tiles_per_split = _cdiv(num_t_tiles, splits)

    return b_blk, num_n_blocks, tile_t, tiles_per_split, splits


def _dice_inter_kernel(logits_ref, target_ref, out_ref):
    """Accumulates per-sample intersection sum_t softmax(logits)[target_t] into out_ref."""
    @pl.when(pl.program_id(2) == 0)
    def _init():
        out_ref[...] = jnp.zeros_like(out_ref)

    x = logits_ref[...].astype(jnp.float32)            # (B, C, Tt)
    tgt = target_ref[...]                              # (B, 1, Tt) int32

    # Numerically stable softmax restricted to the target class; no full softmax,
    # one-hot or cardinality temporaries are materialized.
    m = jnp.max(x, axis=1, keepdims=True)              # (B, 1, Tt)
    e = jnp.exp(x - m)                                 # (B, C, Tt)   (EUP)
    denom = jnp.sum(e, axis=1, keepdims=True)          # (B, 1, Tt)

    cls_ids = jax.lax.broadcasted_iota(jnp.int32, x.shape, 1)
    e_tgt = jnp.sum(jnp.where(cls_ids == tgt, e, 0.0), axis=1, keepdims=True)  # (B, 1, Tt)

    # Padded / out-of-range targets never match any class id -> contribute 0,
    # exactly like an all-zero one-hot row in the reference.
    part = jnp.sum(e_tgt / denom, axis=2)              # (B, 1) per-sample partial

    out_ref[...] = out_ref[...] + jnp.broadcast_to(
        part.reshape(1, 1, part.shape[0], 1), out_ref.shape)


def dice_loss(logits: jax.Array, target: jax.Array, eps: float = 1e-8,
              *, tile_budget_bytes: int | None = None,
              vmem_limit_bytes: int | None = None) -> jax.Array:
    """Pallas TPU implementation of vak's dice_loss.

    logits: (N, C, T) float (native dtype preserved, e.g. bf16); target: (N, T) int.
    Returns a scalar float32.
    """
    assert logits.ndim == 3, "logits must be (N, C, T)"
    assert target.ndim == 2, "target must be (N, T)"
    assert logits.shape[-1] == target.shape[-1], "T mismatch"
    assert logits.shape[0] == target.shape[0], "N mismatch"

    n, c, t = logits.shape
    itemsize = logits.dtype.itemsize

    # Cast BEFORE padding so an unsigned target dtype cannot wrap -1 into a valid id.
    target = target.astype(jnp.int32)

    # Cardinality from the reference:
    #   sum(softmax) over (C,T) == T            (softmax sums to 1 per time bin)
    #   sum(one_hot) over (C,T) == #in-range    (zero rows for out-of-range labels)
    # Tiny (N,T) int reduction; done in XLA, not in the kernel.
    n_in_range = jnp.sum(
        jnp.logical_and(target >= 0, target < c).astype(jnp.float32), axis=-1)  # (N,)
    cardinality = jnp.float32(t) + n_in_range

    cap = _vmem_capacity_bytes()
    if tile_budget_bytes is None:
        # ~3/8 of physical VMEM for the double-buffered input tiles
        # (~24 MiB on v7x's 64 MiB, ~48 MiB on v5e/v6e's 128 MiB).
        tile_budget_bytes = (cap * 3) // 8
    tile_budget_bytes = max(int(tile_budget_bytes), 2 * _LANE * (c * itemsize + 4))

    b_blk, num_n_blocks, tile_t, tiles_per_split, splits = _plan_tiling(
        n, c, t, itemsize, tile_budget_bytes)

    n_total = num_n_blocks * b_blk
    t_total = splits * tiles_per_split * tile_t
    if n_total != n or t_total != t:
        logits = jnp.pad(logits, ((0, n_total - n), (0, 0), (0, t_total - t)))
        target = jnp.pad(target, ((0, n_total - n), (0, t_total - t)),
                         constant_values=-1)
    target3 = target.reshape(n_total, 1, t_total)

    # Explicit scoped-VMEM limit: big enough for the chosen tiles (v5e default is
    # only 16 MiB), but bounded well below physical capacity (v7x = 64 MiB).
    sub = 8 * max(1, 4 // itemsize)
    c_pad = _round_up(c, sub)
    in_block_bytes = b_blk * tile_t * (c_pad * itemsize + 8 * 4)
    out_block_bytes = _round_up(b_blk, 8) * _LANE * 4
    needed = 2 * in_block_bytes + 2 * out_block_bytes
    if vmem_limit_bytes is None:
        vmem_limit_bytes = max(needed + (4 << 20), 32 << 20)
        vmem_limit_bytes = min(vmem_limit_bytes, max(int(cap * 0.9), needed + (2 << 20)))
    vmem_limit_bytes = int(vmem_limit_bytes)

    grid = (num_n_blocks, splits, tiles_per_split)

    cost = pl.CostEstimate(
        flops=6 * n_total * c * t_total,
        transcendentals=n_total * c * t_total,
        bytes_accessed=int(n_total * c * t_total * itemsize
                           + n_total * t_total * 4
                           + num_n_blocks * splits * b_blk * _LANE * 4),
    )

    out = pl.pallas_call(
        _dice_inter_kernel,
        grid=grid,
        in_specs=[
            pl.BlockSpec((b_blk, c, tile_t),
                         lambda i, s, j: (i, 0, s * tiles_per_split + j)),
            pl.BlockSpec((b_blk, 1, tile_t),
                         lambda i, s, j: (i, 0, s * tiles_per_split + j)),
        ],
        out_specs=pl.BlockSpec((1, 1, b_blk, _LANE), lambda i, s, j: (i, s, 0, 0)),
        out_shape=jax.ShapeDtypeStruct((num_n_blocks, splits, b_blk, _LANE),
                                       jnp.float32),
        compiler_params=pltpu.CompilerParams(
            dimension_semantics=("parallel", "parallel", "arbitrary"),
            vmem_limit_bytes=vmem_limit_bytes,
        ),
        cost_estimate=cost,
    )(logits, target3)

    # Combine T-split partials, drop N padding, finish dice + mean in the wrapper.
    intersection = jnp.sum(out[:, :, :, 0], axis=1).reshape(-1)[:n]   # (N,)
    dice = 2.0 * intersection / (cardinality + eps)
    return jnp.mean(1.0 - dice)


class DiceLoss:
    """Mirror of the PyTorch DiceLoss module."""

    def __init__(self, eps: float = 1e-8):
        self.eps = eps

    def __call__(self, logits: jax.Array, target: jax.Array) -> jax.Array:
        return dice_loss(logits, target, self.eps)


def _dice_loss_ref(logits, target, eps=1e-8):
    soft = jax.nn.softmax(logits.astype(jnp.float32), axis=1)
    one_hot = jax.nn.one_hot(target, logits.shape[1], axis=1, dtype=jnp.float32)
    inter = jnp.sum(soft * one_hot, axis=(1, 2))
    card = jnp.sum(soft + one_hot, axis=(1, 2))
    dice = 2.0 * inter / (card + eps)
    return jnp.mean(1.0 - dice)


if __name__ == "__main__":
    N, C, T = 2, 6, 300   # T not a multiple of 128 -> exercises padding/masking
    key = jax.random.PRNGKey(0)
    k1, k2 = jax.random.split(key)
    logits = jax.random.normal(k1, (N, C, T), dtype=jnp.float32)
    target = jax.random.randint(k2, (N, T), 0, C, dtype=jnp.int32)

    ref = _dice_loss_ref(logits, target)

    # Default (budget-driven) tiling: whole T per step, batch split for megacore.
    criterion = DiceLoss()
    loss = criterion(logits, target)
    jax.block_until_ready(loss)
    assert jnp.allclose(loss, ref, atol=1e-5, rtol=1e-5), (loss, ref)

    # Tiny forced budget -> multiple T tiles; exercises the output-resident
    # accumulation (reduction) path.
    loss_small = dice_loss(logits, target, tile_budget_bytes=16 << 10)
    jax.block_until_ready(loss_small)
    assert jnp.allclose(loss_small, ref, atol=1e-5, rtol=1e-5), (loss_small, ref)

    # Single sample -> size-2 parallel T-split path (megacore coverage for N == 1).
    logits1, target1 = logits[:1], target[:1]
    ref1 = _dice_loss_ref(logits1, target1)
    loss1 = dice_loss(logits1, target1, tile_budget_bytes=16 << 10)
    jax.block_until_ready(loss1)
    assert jnp.allclose(loss1, ref1, atol=1e-5, rtol=1e-5), (loss1, ref1)

    # bf16 logits stay bf16 through the DMA; the kernel upcasts per tile.
    logits_bf16 = logits.astype(jnp.bfloat16)
    ref_bf16 = _dice_loss_ref(logits_bf16, target)
    loss_bf16 = dice_loss(logits_bf16, target)
    jax.block_until_ready(loss_bf16)
    assert jnp.allclose(loss_bf16, ref_bf16, atol=1e-5, rtol=1e-5), (loss_bf16, ref_bf16)

    print("KERNEL_OK")
</pallas_src>

<mosaic_0001>
module attributes {stable_mosaic.version = 11 : i64} {
  func.func @_dice_inter_kernel(%arg0: i32, %arg1: i32, %arg2: i32, %arg3: memref<1x6x384xf32, #tpu.memory_space<vmem>>, %arg4: memref<1x1x384xi32, #tpu.memory_space<vmem>>, %arg5: memref<1x1x1x128xf32, #tpu.memory_space<vmem>>) attributes {dimension_semantics = [#tpu.dimension_semantics<parallel>, #tpu.dimension_semantics<parallel>, #tpu.dimension_semantics<arbitrary>], iteration_bounds = array<i64: 2, 1, 1>, scalar_prefetch = 0 : i64, scratch_operands = 0 : i64, tpu.core_type = #tpu.core_type<tc>, window_params = [{transform_indices = @transform_0, window_bounds = array<i64: 1, 6, 384>}, {transform_indices = @transform_1, window_bounds = array<i64: 1, 1, 384>}, {transform_indices = @transform_2, window_bounds = array<i64: 1, 1, 1, 128>}]} {
    %c0_i32 = arith.constant 0 : i32
    %0 = arith.cmpi eq, %arg2, %c0_i32 : i32
    %1 = arith.extui %0 : i1 to i32
    %c0_i32_0 = arith.constant 0 : i32
    %2 = arith.cmpi ne, %1, %c0_i32_0 : i32
    scf.if %2 {
      %cst_18 = arith.constant 0.000000e+00 : f32
      %27 = vector.broadcast %cst_18 : f32 to vector<1x1x1x128xf32>
      %c0_19 = arith.constant 0 : index
      %c0_20 = arith.constant 0 : index
      %c0_21 = arith.constant 0 : index
      %c0_22 = arith.constant 0 : index
      %28 = vector.load %arg5[%c0_19, %c0_20, %c0_21, %c0_22] : memref<1x1x1x128xf32, #tpu.memory_space<vmem>>, vector<1x1x1x128xf32>
      tpu.vector_store %arg5[%c0_19, %c0_20, %c0_21, %c0_22], %27 {strides = array<i32>} : memref<1x1x1x128xf32, #tpu.memory_space<vmem>>, vector<1x1x1x128xf32>,
    } else {
    }
    %c0 = arith.constant 0 : index
    %c0_1 = arith.constant 0 : index
    %c0_2 = arith.constant 0 : index
    %3 = vector.load %arg3[%c0, %c0_1, %c0_2] : memref<1x6x384xf32, #tpu.memory_space<vmem>>, vector<1x6x384xf32>
    %c0_3 = arith.constant 0 : index
    %c0_4 = arith.constant 0 : index
    %c0_5 = arith.constant 0 : index
    %4 = vector.load %arg4[%c0_3, %c0_4, %c0_5] : memref<1x1x384xi32, #tpu.memory_space<vmem>>, vector<1x1x384xi32>
    %cst = arith.constant dense<0xFF800000> : vector<1x384xf32>
    %5 = vector.multi_reduction <maximumf>, %3, %cst [1] : vector<1x6x384xf32> to vector<1x384xf32>
    %6 = vector.shape_cast %5 : vector<1x384xf32> to vector<1x1x384xf32>
    %7 = vector.broadcast %6 : vector<1x1x384xf32> to vector<1x6x384xf32>
    %8 = arith.subf %3, %7 : vector<1x6x384xf32>
    %9 = math.exp %8 : vector<1x6x384xf32>
    %cst_6 = arith.constant dense<0.000000e+00> : vector<1x384xf32>
    %10 = vector.multi_reduction <add>, %9, %cst_6 [1] : vector<1x6x384xf32> to vector<1x384xf32>
    %11 = vector.shape_cast %10 : vector<1x384xf32> to vector<1x1x384xf32>
    %12 = tpu.iota {dimensions = array<i32: 1>} : vector<1x6x384xi32>
    %13 = vector.broadcast %4 : vector<1x1x384xi32> to vector<1x6x384xi32>
    %14 = arith.cmpi eq, %12, %13 : vector<1x6x384xi32>
    %cst_7 = arith.constant 0.000000e+00 : f32
    %15 = vector.broadcast %cst_7 : f32 to vector<1x6x384xf32>
    %16 = arith.select %14, %9, %15 : vector<1x6x384xi1>, vector<1x6x384xf32>
    %cst_8 = arith.constant dense<0.000000e+00> : vector<1x384xf32>
    %17 = vector.multi_reduction <add>, %16, %cst_8 [1] : vector<1x6x384xf32> to vector<1x384xf32>
    %18 = vector.shape_cast %17 : vector<1x384xf32> to vector<1x1x384xf32>
    %19 = arith.divf %18, %11 : vector<1x1x384xf32>
    %cst_9 = arith.constant dense<0.000000e+00> : vector<1x1xf32>
    %20 = vector.multi_reduction <add>, %19, %cst_9 [2] : vector<1x1x384xf32> to vector<1x1xf32>
    %c0_10 = arith.constant 0 : index
    %c0_11 = arith.constant 0 : index
    %c0_12 = arith.constant 0 : index
    %c0_13 = arith.constant 0 : index
    %21 = vector.load %arg5[%c0_10, %c0_11, %c0_12, %c0_13] : memref<1x1x1x128xf32, #tpu.memory_space<vmem>>, vector<1x1x1x128xf32>
    %22 = vector.shape_cast %20 : vector<1x1xf32> to vector<1x1x1x1xf32>
    %23 = vector.shape_cast %22 : vector<1x1x1x1xf32> to vector<1x1x1x1xf32>
    %24 = vector.broadcast %23 : vector<1x1x1x1xf32> to vector<1x1x1x128xf32>
    %25 = arith.addf %21, %24 : vector<1x1x1x128xf32>
    %c0_14 = arith.constant 0 : index
    %c0_15 = arith.constant 0 : index
    %c0_16 = arith.constant 0 : index
    %c0_17 = arith.constant 0 : index
    %26 = vector.load %arg5[%c0_14, %c0_15, %c0_16, %c0_17] : memref<1x1x1x128xf32, #tpu.memory_space<vmem>>, vector<1x1x1x128xf32>
    tpu.vector_store %arg5[%c0_14, %c0_15, %c0_16, %c0_17], %25 {strides = array<i32>} : memref<1x1x1x128xf32, #tpu.memory_space<vmem>>, vector<1x1x1x128xf32>,
    return
  }
  func.func @transform_0(%arg0: i32, %arg1: i32, %arg2: i32) -> (i32, i32, i32) {
    %c1_i32 = arith.constant 1 : i32
    %0 = arith.muli %arg1, %c1_i32 : i32
    %1 = arith.addi %0, %arg2 : i32
    %c0_i32 = arith.constant 0 : i32
    %c0_i32_0 = arith.constant 0 : i32
    return %arg0, %c0_i32, %1 : i32, i32, i32
  }
  func.func @transform_1(%arg0: i32, %arg1: i32, %arg2: i32) -> (i32, i32, i32) {
    %c1_i32 = arith.constant 1 : i32
    %0 = arith.muli %arg1, %c1_i32 : i32
    %1 = arith.addi %0, %arg2 : i32
    %c0_i32 = arith.constant 0 : i32
    %c0_i32_0 = arith.constant 0 : i32
    return %arg0, %c0_i32, %1 : i32, i32, i32
  }
  func.func @transform_2(%arg0: i32, %arg1: i32, %arg2: i32) -> (i32, i32, i32, i32) {
    %c0_i32 = arith.constant 0 : i32
    %c0_i32_0 = arith.constant 0 : i32
    %c0_i32_1 = arith.constant 0 : i32
    return %arg0, %arg1, %c0_i32, %c0_i32_0 : i32, i32, i32, i32
  }
}

</mosaic_0001>

<bundles_post_ra>
// kernel: tpu_custom_call.1
= control target key start
LH: loop header
LB: loop body
LE: loop exit
PB: predicated region body
PF: predicated region fallthrough
CT: control target
= control target key end

     0   :  { %7 = vsyncpa [#allocation3], 0  ;;  %s756_s0 = inlined_call_operand.vmem [shape: f32[2,6,384], index: 0, kind: input, shape index: {}]   ;;  %s757_s1 = inlined_call_operand.vmem [shape: s32[2,1,384], index: 1, kind: input, shape index: {}]   ;;  %s758_s2 = inlined_call_operand.hbm [shape: f32[2,1,1,128], index: 2, kind: output, shape index: {}]  }
   0x1   :  { %9 = vsyncpa [#allocation3 + $0x1], 0  ;;  %s618_s9 = smov 0   ;;  %s620_s10 = smov 0  }
   0x2   :  { %s622_s11 = smov 0   ;;  %s624_s12 = smov 0  }
   0x3   :  { %s626_s13 = smov 0   ;;  %s628_s14 = smov 0  }
   0x4 LB: > { %s442_s15 = sadd.s32 4294967295, %s599_s14   ;;  %s443_s16 = sadd.s32 4294967294, %s599_s14   ;;  %s599_s14 = sphi %s628_s14, %s15_s14   ;;  %s595_s13 = sphi %s626_s13, %s765_s13   ;;  %s591_s12 = sphi %s624_s12, %s764_s12   ;;  %s587_s11 = sphi %s622_s11, %s763_s11   ;;  %s583_s10 = sphi %s620_s10, %s762_s10   ;;  %s579_s9 = sphi %s618_s9, %s761_s9  }
   0x5   : > { %s34_s17 = sadd.s32 1, %s595_s13  ;;  %s103_s18 = sadd.s32 1, %s587_s11 }
   0x6   : > { %p36_p0 = scmp.ge.s32.totalorder %s34_s17, 2  ;;  %p113_p1 = scmp.ne.s32.totalorder %s587_s11, %s583_s10 }
   0x7   : > { %p114_p2 = scmp.eq.s32.totalorder %s442_s15, 1  ;;  %p119_p3 = scmp.ne.s32.totalorder %s583_s10, %s579_s9 }
   0x8   : > { %s767_s17 = smov (%p36_p0, %s34_s17), 0  ;;  %p120_p5 = scmp.eq.s32.totalorder %s443_s16, 1 }
   0x9   : > { %p658_p4 = por %p114_p2, %p113_p1  ;;  %s98_s20 = ssub.s32 %s595_s13, %s767_s17 }
   0xa   : > { %p446_p6 = scmp.ge.s32.totalorder %s599_s14, 1  ;;  %p101_p7 = scmp.eq.s32.totalorder %s98_s20, 0 }
   0xb   : > { %p665_p8 = por %p120_p5, %p119_p3  ;;  %p167_p9 = scmp.lt.s32.totalorder %s599_s14, 3 }
   0xc   : > { %s671_s22 = scalar_select %p101_p7, %s587_s11, %s103_s18  }
   0xd   : > { %p168_p10 = pnand %p446_p6, %p167_p9 }
   0xe   : > { %p204_p11 = scmp.lt.s32.totalorder (!%p168_p10), %s591_s12, 1  ;;  %s200_s23 = sand.u32 (!%p168_p10), 1, %s583_s10   ;;  %v601_v0 = vmov (!%p168_p10), 0.0   ;;  %vm234_vm0 = vcmask (!%p168_p10), 1045504   ;;  %v286_v22 = vlaneseq (!%p168_p10) }
   0xf   : > { %171 = sbr.rel (%p168_p10) target bundleno = 245 (0xf5), region = 28  ;;  %s680_s25 = scalar_lea.vmem (!%p168_p10), [#allocation2], %s200_s23 }
  0x10   : > { %229 = vst [vmem:[%s680_s25] sm:$0x1] (!%p168_p10), %v601_v0  ;;  %v287_v29 = vshrl.u32 (!%p168_p10), %v286_v22, 7  ;;  %s448_s6 = sshll.u32 (!%p168_p10), %s591_s12, 4  ;;  %s354_s7 = sshll.u32 (!%p168_p10), %s680_s25, 4  ;;  %s708_s7 = int_to_ptr.vmem [resolvable:$true] %s354_s7 }
  0x11   : > { %s706_s16 = scalar_lea.hbm (!%p168_p10), %s758_s2, %s448_s6  ;;  %s341_s18 = scalar_lea.sflag (!%p168_p10), [#allocation3], %s200_s23 }
  0x12   : > { %v290_v33 = vsub.s32 (!%p168_p10), 0, %v287_v29  ;;  %v294_v35 = vsub.s32 (!%p168_p10), 1, %v287_v29  ;;  %v298_v36 = vsub.s32 (!%p168_p10), 2, %v287_v29  ;;  %s521_s20 = scalar_lea.vmem (!%p168_p10), %s708_s7, 16 }
  0x13   : > { %p522_p12 = scmp.ne.s32.totalorder (!%p168_p10), %s708_s7, %s521_s20 }
  0x15   : > { %p523_p13 = pnand (!%p168_p10), %p522_p12, %p658_p4 }
  0x16   : > { %s676_s24 = scalar_select %p204_p11, %s591_s12, 1 }
  0x17   : > { %p524_p0 = pneg %p523_p13  ;;  %s602_s12 = smov [#allocation2]  }
  0x18   : > { %s451_s26 = smul.u32 24, %s676_s24 }
  0x19   : > { %s452_s30 = smul.u32 3, %s676_s24  ;;  %s525_s24 = sshll.u32 %s602_s12, 4  ;;  %s526_s24 = int_to_ptr.vmem [resolvable:$false] %s525_s24 }
  0x1a   : > { %s211_s29 = scalar_lea.vmem %s756_s0, %s451_s26  ;;  %s527_s26 = scalar_lea.vmem %s526_s24, 32 }
  0x1b   : > { %v230_v1 = vld [vmem:[%s211_s29] sm:$0x3f]  ;;  %v231_v2 = vld [vmem:[%s211_s29 + $0x8] sm:$0x3f]  ;;  %v232_v3 = vld [vmem:[%s211_s29 + $0x10] sm:$0x3f]  ;;  %s222_s5 = scalar_lea.vmem %s757_s1, %s452_s30  ;;  %p528_p1 = scmp.lt.s32.totalorder %s708_s7, %s526_s24 }
  0x1c   : > { %v235_v4 = vsel %vm234_vm0, %v230_v1, -inf  ;;  %v242_v5 = vsel %vm234_vm0, %v231_v2, -inf  ;;  %v249_v6 = vsel %vm234_vm0, %v232_v3, -inf  ;;  %v233_v34 = vld [vmem:[%s222_s5] sm:$0x7]  ;;  %p529_p2 = scmp.lt.s32.totalorder %s527_s26, %s521_s20 }
  0x1d   : > { %v236_v7 = vrot.slane %v235_v4, 4  ;;  %v243_v8 = vrot.slane %v242_v5, 4  ;;  %v250_v9 = vrot.slane %v249_v6, 4  ;;  %v291_v37 = vrot.slane %v233_v34, %v290_v33 }
  0x1e   : > { %v295_v38 = vrot.slane %v233_v34, %v294_v35  ;;  %v299_v39 = vrot.slane %v233_v34, %v298_v36  ;;  %p530_p3 = por %p529_p2, %p528_p1 }
  0x1f   : > { %v237_v10 = vmax.f32 %v235_v4, %v236_v7  ;;  %v244_v11 = vmax.f32 %v242_v5, %v243_v8  ;;  %v251_v12 = vmax.f32 %v249_v6, %v250_v9  ;;  %vm300_vm1 = vcmp.eq.s32.totalorder %v287_v29, %v291_v37 }
  0x20   : > { %vm301_vm2 = vcmp.eq.s32.totalorder %v287_v29, %v295_v38  ;;  %vm302_vm3 = vcmp.eq.s32.totalorder %v287_v29, %v299_v39  ;;  %p531_p5 = pnand %p530_p3, %p524_p0 }
  0x21   : > { %v238_v13 = vrot.slane %v237_v10, 2  ;;  %v245_v14 = vrot.slane %v244_v11, 2  ;;  %v252_v15 = vrot.slane %v251_v12, 2 }
  0x23   : > { %v239_v16 = vmax.f32 %v237_v10, %v238_v13  ;;  %v246_v17 = vmax.f32 %v244_v11, %v245_v14  ;;  %v253_v18 = vmax.f32 %v251_v12, %v252_v15 }
  0x25   : > { %v240_v19 = vrot.slane %v239_v16, 1  ;;  %v247_v20 = vrot.slane %v246_v17, 1  ;;  %v254_v21 = vrot.slane %v253_v18, 1 }
  0x27   : > { %v241_v23 = vmax.f32 %v239_v16, %v240_v19  ;;  %v248_v24 = vmax.f32 %v246_v17, %v247_v20  ;;  %v255_v25 = vmax.f32 %v253_v18, %v254_v21 }
  0x29   : > { %v256_v26 = vsub.f32 %v230_v1, %v241_v23  ;;  %v257_v27 = vsub.f32 %v231_v2, %v248_v24  ;;  %v258_v28 = vsub.f32 %v232_v3, %v255_v25 }
  0x2b   : > { %v259_v30 = vmul.f32 1.442695, %v256_v26  ;;  %v261_v31 = vmul.f32 1.442695, %v257_v27  ;;  %v263_v32 = vmul.f32 1.442695, %v258_v28 }
  0x2d   : > { %509 = vpow2.f32 %v259_v30 }
  0x2e   : > { %511 = vpow2.f32 %v261_v31 }
  0x2f   : > { %513 = vpow2.f32 %v263_v32  ;;  %v337_v32 = vld [vmem:[%s680_s25] sm:$0x1] }
  0x37   : > { %v510_v40 = vpop.eup %509 }
  0x38   : > { %v512_v41 = vpop.eup %511  ;;  %v265_v42 = vsel %vm234_vm0, %v510_v40, 0.0  ;;  %v303_v43 = vsel %vm300_vm1, %v510_v40, 0.0 }
  0x39   : > { %v514_v44 = vpop.eup %513  ;;  %v266_v45 = vrot.slane %v265_v42, 4  ;;  %v272_v46 = vsel %vm234_vm0, %v512_v41, 0.0  ;;  %v304_v47 = vsel %vm301_vm2, %v512_v41, 0.0  ;;  %v306_v48 = vsel %vm234_vm0, %v303_v43, 0.0 }
  0x3a   : > { %v273_v49 = vrot.slane %v272_v46, 4  ;;  %v279_v50 = vsel %vm234_vm0, %v514_v44, 0.0  ;;  %v305_v51 = vsel %vm302_vm3, %v514_v44, 0.0  ;;  %v307_v52 = vrot.slane %v306_v48, 4 }
  0x3b   : > { %v267_v53 = vadd.f32 %v266_v45, %v265_v42  ;;  %v280_v54 = vrot.slane %v279_v50, 4  ;;  %v313_v55 = vsel %vm234_vm0, %v304_v47, 0.0  ;;  %v320_v56 = vsel %vm234_vm0, %v305_v51, 0.0 }
  0x3c   : > { %v274_v57 = vadd.f32 %v273_v49, %v272_v46  ;;  %v308_v58 = vadd.f32 %v307_v52, %v306_v48  ;;  %v314_v59 = vrot.slane %v313_v55, 4  ;;  %v321_v60 = vrot.slane %v320_v56, 4 }
  0x3d   : > { %v268_v61 = vrot.slane %v267_v53, 2  ;;  %v281_v62 = vadd.f32 %v280_v54, %v279_v50 }
  0x3e   : > { %v275_v63 = vrot.slane %v274_v57, 2  ;;  %v315_v0 = vadd.f32 %v314_v59, %v313_v55  ;;  %v322_v1 = vadd.f32 %v321_v60, %v320_v56  ;;  %v309_v5 = vrot.slane %v308_v58, 2 }
  0x3f   : > { %v269_v2 = vadd.f32 %v268_v61, %v267_v53  ;;  %v282_v3 = vrot.slane %v281_v62, 2 }
  0x40   : > { %v276_v4 = vadd.f32 %v275_v63, %v274_v57  ;;  %v316_v8 = vrot.slane %v315_v0, 2  ;;  %v323_v10 = vrot.slane %v322_v1, 2  ;;  %v310_v14 = vadd.f32 %v309_v5, %v308_v58 }
  0x41   : > { %v270_v6 = vrot.slane %v269_v2, 1  ;;  %v283_v7 = vadd.f32 %v282_v3, %v281_v62 }
  0x42   : > { %v277_v9 = vrot.slane %v276_v4, 1  ;;  %v317_v16 = vadd.f32 %v316_v8, %v315_v0  ;;  %v324_v17 = vadd.f32 %v323_v10, %v322_v1  ;;  %v311_v18 = vrot.slane %v310_v14, 1 }
  0x43   : > { %v271_v11 = vadd.f32 %v270_v6, %v269_v2  ;;  %v284_v12 = vrot.slane %v283_v7, 1 }
  0x44   : > { %v278_v13 = vadd.f32 %v277_v9, %v276_v4  ;;  %v318_v19 = vrot.slane %v317_v16, 1  ;;  %v325_v20 = vrot.slane %v324_v17, 1  ;;  %v312_v21 = vadd.f32 %v311_v18, %v310_v14 }
  0x45   : > { %v285_v15 = vadd.f32 %v284_v12, %v283_v7  ;;  %515 = vrcp.f32 %v271_v11 }
  0x46   : > { %517 = vrcp.f32 %v278_v13  ;;  %v319_v22 = vadd.f32 %v318_v19, %v317_v16  ;;  %v326_v23 = vadd.f32 %v325_v20, %v324_v17 }
  0x47   : > { %519 = vrcp.f32 %v285_v15 }
  0x4f   : > { %v516_v24 = vpop.eup %515 }
  0x50   : > { %v518_v25 = vpop.eup %517  ;;  %v328_v26 = vmul.f32 %v516_v24, %v312_v21 }
  0x51   : > { %v520_v27 = vpop.eup %519  ;;  %v330_v28 = vmul.f32 %v518_v25, %v319_v22 }
  0x52   : > { %v332_v29 = vmul.f32 %v520_v27, %v326_v23 }
  0x53   : > { %v333_v30 = vadd.f32 %v330_v28, %v328_v26 }
  0x55   : > { %v334_v31 = vadd.f32 %v333_v30, %v332_v29 }
  0x57   : > { %335 = vadd.xlane.f32.xlu0 %v334_v31 }
  0xe4   : > { %v336_v33 = vpop.xlane.xlu0 %335 }
  0xe5   : > { %v338_v34 = vadd.f32 %v337_v32, %v336_v33 }
  0xe7   : > { %339 = vst [vmem:[%s680_s25] sm:$0x1] %v338_v34 }
  0xe8   : > { %534 = shalt.err (!%p531_p5)
}
  0xe9   : > { %s535_s23 = scalar_lea.hbm %s706_s16, 16  ;;  %s539_s28 = scalar_lea.hbm %s758_s2, 32 }
  0xea   : > { %p536_p6 = scmp.ne.s32.totalorder %s706_s16, %s535_s23  ;;  %p540_p10 = scmp.lt.u32.totalorder %s706_s16, %s758_s2 }
  0xeb   : > { %p541_p11 = scmp.lt.u32.totalorder %s539_s28, %s535_s23  ;;  %p543_p13 = scmp.lt.u32.totalorder %s535_s23, %s706_s16 }
  0xec   : > { %p537_p7 = pnand %p536_p6, %p658_p4 }
  0xed   : > { %p542_p12 = por %p541_p11, %p540_p10 }
  0xee   : > { %p538_p9 = pneg %p537_p7 }
  0xef   : > { %p544_p0 = por %p543_p13, %p542_p12 }
  0xf1   : > { %p545_p1 = pnand %p544_p0, %p538_p9 }
  0xf3   : > { %548 = shalt.err (!%p545_p1)
}
  0xf4   : > { %453 = dma.vmem_to_hbm [thread:$0]  (%p658_p4), %s708_s7, 16, %s706_s16, %s341_s18  }
  0xf5 PF: > { %p459_p2 = scmp.ge.s32.totalorder %s599_s14, 2  ;;  %s366_s3 = sand.u32 1, %s579_s9  }
  0xf6   : > { %s367_s4 = scalar_lea.sflag [#allocation3], %s366_s3 }
  0xf7   : > { %p456_p3 = pnand %p459_p2, %p665_p8 }
  0xf9   : > { %574 = dma.done.wait (!%p456_p3), %s367_s4, 16  }
  0xfa   : > { %576 = vsyncadd (!%p456_p3), %s367_s4, 4294967280  ;;  %s15_s14 = sadd.s32 1, %s599_s14   ;;  %s761_s9 = smov %s583_s10 }
  0xfb   : > { %p12_p5 = scmp.ge.s32.totalorder %s15_s14, 4   ;;  %s762_s10 = smov %s587_s11 }
  0xfc   : > { %s763_s11 = smov %s671_s22  ;;  %s764_s12 = smov %s595_s13 }
  0xfd   : > { %s765_s13 = smov %s767_s17  ;;  %14 = sbr.rel (!%p12_p5) target bundleno = 4 (0x4), region = 70 }
 0x104   :  { %371 = vsyncpa [#allocation3], 1 }
 0x105   :  { %373 = vsyncpa [#allocation3 + $0x1], 1 }

</bundles_post_ra>
